<compile_context>
chip_gen: v7x
topology: tpu7x:2x2x1
jax: 0.10.0
libtpu: 0.0.40
codegen_flags: <defaults>
</compile_context>

<pallas_src>
import functools

import jax
import jax.numpy as jnp
from jax.experimental import pallas as pl
from jax.experimental.pallas import tpu as pltpu


def _round_up(x, m):
    return (x + m - 1) // m * m


def _pick_tile(b_pad, block_b, min_steps=2):
    """Largest multiple-of-8 tile that divides b_pad, is <= block_b, and (when the
    batch is big enough) leaves at least `min_steps` grid steps so the 'parallel'
    batch axis can shard across v7x's two TensorCores."""
    assert b_pad % 8 == 0
    cap = min(block_b, b_pad)
    if b_pad >= 8 * min_steps:
        cap = min(cap, b_pad // min_steps)
    cap = max(8, (cap // 8) * 8)
    n = b_pad // 8
    best = 8
    d = 1
    while 8 * d <= cap:
        if n % d == 0:
            best = 8 * d
        d += 1
    return best


def fused_ppo_kernel(obs_ref, w1_ref, w2_ref, w3_ref, b12_ref, b3_ref, out_ref):
    """Fused policy+value MLP: 3 lane-dense matmuls, narrow lane-packed output."""
    x = obs_ref[...].astype(w1_ref.dtype)

    # Layer 1: [TB, obs_dim] @ [obs_dim, H2]   (bias add + ReLU in f32)
    h = jnp.dot(x, w1_ref[...], preferred_element_type=jnp.float32)
    h = jnp.maximum(h + b12_ref[0:1, :], 0.0)

    # Layer 2: [TB, H2] @ [H2, H2]  (block-diagonal -> no cross-head talk)
    h = jnp.dot(h.astype(w2_ref.dtype), w2_ref[...], preferred_element_type=jnp.float32)
    h = jnp.maximum(h + b12_ref[1:2, :], 0.0)

    # Layer 3: [TB, H2] @ [H2, OUT_W]  (mean in lanes [:act_dim], value in lane act_dim)
    out = jnp.dot(h.astype(w3_ref.dtype), w3_ref[...], preferred_element_type=jnp.float32)
    out = out + b3_ref[...]

    out_ref[...] = out.astype(out_ref.dtype)


def pack_params(p, param_dtype=jnp.float32):
    """Pack the 12 Linear params into 3 fused weights + 2 bias slabs (done once).

    param_dtype=bf16 is a supported fast path on v5e/v6e/v7x (MXU is bf16-native);
    biases stay f32 so adds/ReLU are exact. If value-head precision matters for PPO
    advantages, keep param_dtype=f32 (weights total < 100 KB either way).
    """
    obs_dim, hidden = p["pw1"].shape
    act_dim = p["pw3"].shape[1]
    H2 = _round_up(2 * hidden, 128)
    OUT_W = _round_up(act_dim + 1, 8)     # narrow output slab (HBM write dominates)

    w1 = jnp.zeros((obs_dim, H2), jnp.float32)
    w1 = w1.at[:, :hidden].set(p["pw1"]).at[:, hidden:2 * hidden].set(p["vw1"])

    w2 = jnp.zeros((H2, H2), jnp.float32)
    w2 = w2.at[:hidden, :hidden].set(p["pw2"])
    w2 = w2.at[hidden:2 * hidden, hidden:2 * hidden].set(p["vw2"])

    w3 = jnp.zeros((H2, OUT_W), jnp.float32)
    w3 = w3.at[:hidden, :act_dim].set(p["pw3"])
    w3 = w3.at[hidden:2 * hidden, act_dim:act_dim + 1].set(p["vw3"])

    b12 = jnp.zeros((2, H2), jnp.float32)
    b12 = b12.at[0, :hidden].set(p["pb1"][0]).at[0, hidden:2 * hidden].set(p["vb1"][0])
    b12 = b12.at[1, :hidden].set(p["pb2"][0]).at[1, hidden:2 * hidden].set(p["vb2"][0])

    b3 = jnp.zeros((1, OUT_W), jnp.float32)
    b3 = b3.at[0, :act_dim].set(p["pb3"][0]).at[0, act_dim:act_dim + 1].set(p["vb3"][0])

    return {"w1": w1.astype(param_dtype),
            "w2": w2.astype(param_dtype),
            "w3": w3.astype(param_dtype),
            "b12": b12, "b3": b3}


@functools.partial(jax.jit, static_argnames=("act_dim", "block_b"))
def ppo_forward(obs, packed, act_dim, block_b=1024):
    """Forward pass. obs may be f32 or bf16 (kernel casts to the weight dtype)."""
    B, obs_dim = obs.shape
    w1, w2, w3 = packed["w1"], packed["w2"], packed["w3"]
    b12, b3 = packed["b12"], packed["b3"]
    H2 = w1.shape[1]
    OUT_W = w3.shape[1]

    # Pad the batch only to a multiple of 8 (usually a no-op), never to the tile.
    B_pad = _round_up(B, 8)
    if B_pad != B:
        obs = jnp.pad(obs, ((0, B_pad - B), (0, 0)))
    TB = _pick_tile(B_pad, block_b)
    grid = (B_pad // TB,)

    flops = 2 * B_pad * (obs_dim * H2 + H2 * H2 + H2 * OUT_W)
    bytes_accessed = (obs.size * obs.dtype.itemsize
                      + w1.size * w1.dtype.itemsize
                      + w2.size * w2.dtype.itemsize
                      + w3.size * w3.dtype.itemsize
                      + b12.size * 4 + b3.size * 4
                      + B_pad * OUT_W * 4)

    # Double-buffered obs + out tiles, plus (double-buffered) resident weights.
    vmem_need = (2 * TB * obs_dim * obs.dtype.itemsize
                 + 2 * TB * OUT_W * 4
                 + 2 * (w1.size * w1.dtype.itemsize + w2.size * w2.dtype.itemsize
                        + w3.size * w3.dtype.itemsize + b12.size * 4 + b3.size * 4))
    vmem_limit = int(min(max(2 * vmem_need + (1 << 20), 16 << 20), 64 << 20))

    out = pl.pallas_call(
        fused_ppo_kernel,
        out_shape=jax.ShapeDtypeStruct((B_pad, OUT_W), jnp.float32),
        grid=grid,
        in_specs=[
            pl.BlockSpec((TB, obs_dim), lambda i: (i, 0)),     # obs: tiled over batch
            pl.BlockSpec((obs_dim, H2), lambda i: (0, 0)),     # weights: constant block
            pl.BlockSpec((H2, H2), lambda i: (0, 0)),          #   -> stay VMEM-resident
            pl.BlockSpec((H2, OUT_W), lambda i: (0, 0)),
            pl.BlockSpec((2, H2), lambda i: (0, 0)),
            pl.BlockSpec((1, OUT_W), lambda i: (0, 0)),
        ],
        out_specs=pl.BlockSpec((TB, OUT_W), lambda i: (i, 0)),
        compiler_params=pltpu.CompilerParams(
            dimension_semantics=("parallel",),                 # v7x: shard over 2 TCs
            vmem_limit_bytes=vmem_limit),
        cost_estimate=pl.CostEstimate(flops=flops, transcendentals=0,
                                      bytes_accessed=bytes_accessed),
    )(obs, w1, w2, w3, b12, b3)

    # Downstream consumers that can take the packed slab should use `out` directly
    # (lanes [:act_dim] = mean, lane act_dim = value) and skip these slices.
    mean = out[:B, :act_dim]
    value = out[:B, act_dim:act_dim + 1]
    return mean, value


def init_params(key, obs_dim, act_dim, hidden_size=64):
    """Deterministic init mimicking nn.Linear default (uniform +/- 1/sqrt(fan_in))."""
    def linear(key, fan_in, fan_out):
        kw, kb = jax.random.split(key)
        bound = 1.0 / jnp.sqrt(fan_in)
        w = jax.random.uniform(kw, (fan_in, fan_out), jnp.float32, -bound, bound)
        b = jax.random.uniform(kb, (1, fan_out), jnp.float32, -bound, bound)
        return w, b

    keys = jax.random.split(key, 6)
    pw1, pb1 = linear(keys[0], obs_dim, hidden_size)
    pw2, pb2 = linear(keys[1], hidden_size, hidden_size)
    pw3, pb3 = linear(keys[2], hidden_size, act_dim)
    vw1, vb1 = linear(keys[3], obs_dim, hidden_size)
    vw2, vb2 = linear(keys[4], hidden_size, hidden_size)
    vw3, vb3 = linear(keys[5], hidden_size, 1)
    # log_std parameter exists in the module but is unused by forward().
    log_std = jnp.zeros((act_dim,), jnp.float32)
    return {"pw1": pw1, "pb1": pb1, "pw2": pw2, "pb2": pb2, "pw3": pw3, "pb3": pb3,
            "vw1": vw1, "vb1": vb1, "vw2": vw2, "vb2": vb2, "vw3": vw3, "vb3": vb3,
            "log_std": log_std}


def ppo_forward_ref(obs, p):
    """Pure-JAX reference of the PyTorch forward."""
    h = jnp.maximum(obs @ p["pw1"] + p["pb1"], 0.0)
    h = jnp.maximum(h @ p["pw2"] + p["pb2"], 0.0)
    mean = h @ p["pw3"] + p["pb3"]
    g = jnp.maximum(obs @ p["vw1"] + p["vb1"], 0.0)
    g = jnp.maximum(g @ p["vw2"] + p["vb2"], 0.0)
    value = g @ p["vw3"] + p["vb3"]
    return mean, value


if __name__ == "__main__":
    B, OBS_DIM, ACT_DIM, HIDDEN = 256, 32, 8, 64

    key = jax.random.PRNGKey(0)
    k_obs, k_params = jax.random.split(key)
    obs = jax.random.normal(k_obs, (B, OBS_DIM), jnp.float32)
    params = init_params(k_params, OBS_DIM, ACT_DIM, HIDDEN)
    mean_ref, value_ref = ppo_forward_ref(obs, params)

    # f32 weights: exact match to the reference.
    packed_f32 = pack_params(params, jnp.float32)
    mean, value = ppo_forward(obs, packed_f32, act_dim=ACT_DIM)
    mean = jax.block_until_ready(mean)
    value = jax.block_until_ready(value)
    assert mean.shape == (B, ACT_DIM) and value.shape == (B, 1)
    assert jnp.allclose(mean, mean_ref, atol=1e-4, rtol=1e-4)
    assert jnp.allclose(value, value_ref, atol=1e-4, rtol=1e-4)

    # bf16 weight path (MXU-native on v5e/v6e/v7x, f32 accumulation): relaxed tol.
    packed_bf16 = pack_params(params, jnp.bfloat16)
    mean_b, value_b = ppo_forward(obs, packed_bf16, act_dim=ACT_DIM)
    mean_b = jax.block_until_ready(mean_b)
    value_b = jax.block_until_ready(value_b)
    assert jnp.allclose(mean_b, mean_ref, atol=1e-1)
    assert jnp.allclose(value_b, value_ref, atol=1e-1)

    # Non-multiple-of-8 batch (exercises the tiny 8-row pad + divisor tile picker).
    obs_odd = obs[:37]
    mean_o, value_o = ppo_forward(obs_odd, packed_f32, act_dim=ACT_DIM)
    mean_o = jax.block_until_ready(mean_o)
    assert mean_o.shape == (37, ACT_DIM) and value_o.shape == (37, 1)
    assert jnp.allclose(mean_o, mean_ref[:37], atol=1e-4, rtol=1e-4)
    assert jnp.allclose(value_o, value_ref[:37], atol=1e-4, rtol=1e-4)

    # TODO(synk): get_action's Normal sampling / log_prob / entropy are stochastic
    # distribution ops outside the forward() hot path and are not implemented here.
    print("KERNEL_OK")
</pallas_src>

<mosaic_0001>
module attributes {stable_mosaic.version = 11 : i64} {
  func.func @fused_ppo_kernel(%arg0: i32, %arg1: memref<128x32xf32, #tpu.memory_space<vmem>>, %arg2: memref<32x128xf32, #tpu.memory_space<vmem>>, %arg3: memref<128x128xf32, #tpu.memory_space<vmem>>, %arg4: memref<128x16xf32, #tpu.memory_space<vmem>>, %arg5: memref<2x128xf32, #tpu.memory_space<vmem>>, %arg6: memref<1x16xf32, #tpu.memory_space<vmem>>, %arg7: memref<128x16xf32, #tpu.memory_space<vmem>>) attributes {dimension_semantics = [#tpu.dimension_semantics<parallel>], iteration_bounds = array<i64: 2>, scalar_prefetch = 0 : i64, scratch_operands = 0 : i64, tpu.core_type = #tpu.core_type<tc>, window_params = [{transform_indices = @transform_0, window_bounds = array<i64: 128, 32>}, {pipeline_mode = #tpu.pipeline_mode<synchronous>, transform_indices = @transform_1, window_bounds = array<i64: 32, 128>}, {pipeline_mode = #tpu.pipeline_mode<synchronous>, transform_indices = @transform_2, window_bounds = array<i64: 128, 128>}, {pipeline_mode = #tpu.pipeline_mode<synchronous>, transform_indices = @transform_3, window_bounds = array<i64: 128, 16>}, {pipeline_mode = #tpu.pipeline_mode<synchronous>, transform_indices = @transform_4, window_bounds = array<i64: 2, 128>}, {pipeline_mode = #tpu.pipeline_mode<synchronous>, transform_indices = @transform_5, window_bounds = array<i64: 1, 16>}, {transform_indices = @transform_6, window_bounds = array<i64: 128, 16>}]} {
    %c0 = arith.constant 0 : index
    %c0_0 = arith.constant 0 : index
    %0 = vector.load %arg1[%c0, %c0_0] : memref<128x32xf32, #tpu.memory_space<vmem>>, vector<128x32xf32>
    %c0_1 = arith.constant 0 : index
    %c0_2 = arith.constant 0 : index
    %1 = vector.load %arg2[%c0_1, %c0_2] : memref<32x128xf32, #tpu.memory_space<vmem>>, vector<32x128xf32>
    %cst = arith.constant dense<0.000000e+00> : vector<128x128xf32>
    %2 = tpu.matmul %0, %1, %cst {dimension_numbers = #tpu.dot_dimension_numbers<[1], [0], [0], [1], [0, 0, 1, 1], [], []>} : vector<128x32xf32>, vector<32x128xf32>, vector<128x128xf32> -> vector<128x128xf32>
    %c0_3 = arith.constant 0 : index
    %c0_4 = arith.constant 0 : index
    %3 = vector.load %arg5[%c0_3, %c0_4] : memref<2x128xf32, #tpu.memory_space<vmem>>, vector<1x128xf32>
    %4 = vector.broadcast %3 : vector<1x128xf32> to vector<128x128xf32>
    %5 = arith.addf %2, %4 : vector<128x128xf32>
    %cst_5 = arith.constant 0.000000e+00 : f32
    %6 = vector.broadcast %cst_5 : f32 to vector<128x128xf32>
    %7 = arith.maximumf %5, %6 : vector<128x128xf32>
    %c0_6 = arith.constant 0 : index
    %c0_7 = arith.constant 0 : index
    %8 = vector.load %arg3[%c0_6, %c0_7] : memref<128x128xf32, #tpu.memory_space<vmem>>, vector<128x128xf32>
    %cst_8 = arith.constant dense<0.000000e+00> : vector<128x128xf32>
    %9 = tpu.matmul %7, %8, %cst_8 {dimension_numbers = #tpu.dot_dimension_numbers<[1], [0], [0], [1], [0, 0, 1, 1], [], []>} : vector<128x128xf32>, vector<128x128xf32>, vector<128x128xf32> -> vector<128x128xf32>
    %c1 = arith.constant 1 : index
    %c0_9 = arith.constant 0 : index
    %10 = vector.load %arg5[%c1, %c0_9] : memref<2x128xf32, #tpu.memory_space<vmem>>, vector<1x128xf32>
    %11 = vector.broadcast %10 : vector<1x128xf32> to vector<128x128xf32>
    %12 = arith.addf %9, %11 : vector<128x128xf32>
    %cst_10 = arith.constant 0.000000e+00 : f32
    %13 = vector.broadcast %cst_10 : f32 to vector<128x128xf32>
    %14 = arith.maximumf %12, %13 : vector<128x128xf32>
    %c0_11 = arith.constant 0 : index
    %c0_12 = arith.constant 0 : index
    %15 = vector.load %arg4[%c0_11, %c0_12] : memref<128x16xf32, #tpu.memory_space<vmem>>, vector<128x16xf32>
    %cst_13 = arith.constant dense<0.000000e+00> : vector<128x16xf32>
    %16 = tpu.matmul %14, %15, %cst_13 {dimension_numbers = #tpu.dot_dimension_numbers<[1], [0], [0], [1], [0, 0, 1, 1], [], []>} : vector<128x128xf32>, vector<128x16xf32>, vector<128x16xf32> -> vector<128x16xf32>
    %c0_14 = arith.constant 0 : index
    %c0_15 = arith.constant 0 : index
    %17 = vector.load %arg6[%c0_14, %c0_15] : memref<1x16xf32, #tpu.memory_space<vmem>>, vector<1x16xf32>
    %18 = vector.broadcast %17 : vector<1x16xf32> to vector<128x16xf32>
    %19 = arith.addf %16, %18 : vector<128x16xf32>
    %c0_16 = arith.constant 0 : index
    %c0_17 = arith.constant 0 : index
    %20 = vector.load %arg7[%c0_16, %c0_17] : memref<128x16xf32, #tpu.memory_space<vmem>>, vector<128x16xf32>
    tpu.vector_store %arg7[%c0_16, %c0_17], %19 {strides = array<i32>} : memref<128x16xf32, #tpu.memory_space<vmem>>, vector<128x16xf32>,
    return
  }
  func.func @transform_0(%arg0: i32) -> (i32, i32) {
    %c0_i32 = arith.constant 0 : i32
    %c0_i32_0 = arith.constant 0 : i32
    return %arg0, %c0_i32 : i32, i32
  }
  func.func @transform_1(%arg0: i32) -> (i32, i32) {
    %c0_i32 = arith.constant 0 : i32
    %c0_i32_0 = arith.constant 0 : i32
    %c0_i32_1 = arith.constant 0 : i32
    return %c0_i32, %c0_i32_0 : i32, i32
  }
  func.func @transform_2(%arg0: i32) -> (i32, i32) {
    %c0_i32 = arith.constant 0 : i32
    %c0_i32_0 = arith.constant 0 : i32
    %c0_i32_1 = arith.constant 0 : i32
    return %c0_i32, %c0_i32_0 : i32, i32
  }
  func.func @transform_3(%arg0: i32) -> (i32, i32) {
    %c0_i32 = arith.constant 0 : i32
    %c0_i32_0 = arith.constant 0 : i32
    %c0_i32_1 = arith.constant 0 : i32
    return %c0_i32, %c0_i32_0 : i32, i32
  }
  func.func @transform_4(%arg0: i32) -> (i32, i32) {
    %c0_i32 = arith.constant 0 : i32
    %c0_i32_0 = arith.constant 0 : i32
    %c0_i32_1 = arith.constant 0 : i32
    return %c0_i32, %c0_i32_0 : i32, i32
  }
  func.func @transform_5(%arg0: i32) -> (i32, i32) {
    %c0_i32 = arith.constant 0 : i32
    %c0_i32_0 = arith.constant 0 : i32
    %c0_i32_1 = arith.constant 0 : i32
    return %c0_i32, %c0_i32_0 : i32, i32
  }
  func.func @transform_6(%arg0: i32) -> (i32, i32) {
    %c0_i32 = arith.constant 0 : i32
    %c0_i32_0 = arith.constant 0 : i32
    return %arg0, %c0_i32 : i32, i32
  }
}

</mosaic_0001>

<bundles_post_ra>
// kernel: ppo_forward.1
= control target key start
LH: loop header
LB: loop body
LE: loop exit
PB: predicated region body
PF: predicated region fallthrough
CT: control target
= control target key end

     0   :  { %s1310_s21 = smov 0   ;;  %s1561_s0 = inlined_call_operand.vmem [shape: f32[256,32], index: 0, kind: input, shape index: {}]   ;;  %s1562_s1 = inlined_call_operand.vmem [shape: f32[32,128], index: 1, kind: input, shape index: {}]   ;;  %s1563_s2 = inlined_call_operand.vmem [shape: f32[128,128], index: 2, kind: input, shape index: {}]   ;;  %s1564_s3 = inlined_call_operand.vmem [shape: f32[128,16], index: 3, kind: input, shape index: {}]   ;;  %s1565_s4 = inlined_call_operand.vmem [shape: f32[2,128], index: 4, kind: input, shape index: {}]   ;;  %s1566_s5 = inlined_call_operand.vmem [shape: f32[1,16], index: 5, kind: input, shape index: {}]   ;;  %s1567_s6 = inlined_call_operand.vmem [shape: f32[256,16], index: 6, kind: output, shape index: {}]  }
   0x1 LB: > { %s913_s22 = sadd.s32 4294967295, %s1273_s21   ;;  %p917_p0 = scmp.ge.s32.totalorder %s1273_s21, 1  ;;  %s1273_s21 = sphi %s1310_s21, %s16_s21  }
   0x2   : > { %p213_p1 = scmp.lt.s32.totalorder %s1273_s21, 3 }
   0x4   : > { %p214_p2 = pnand %p917_p0, %p213_p1 }
   0x5   : > { %v271_v0 = vld [vmem:[%s1562_s1] sm:$0xff] (!%p214_p2)  ;;  %v272_v1 = vld [vmem:[%s1562_s1 + $0x8] sm:$0xff] (!%p214_p2)  ;;  %v273_v2 = vld [vmem:[%s1562_s1 + $0x10] sm:$0xff] (!%p214_p2)  ;;  %s918_s29 = sshll.u32 (!%p214_p2), %s913_s22, 4  ;;  %vm280_vm0 = vcmask (!%p214_p2), 261120   ;;  %vm840_vm1 = vcmask (!%p214_p2), 130048  }
   0x6   : > { %217 = sbr.rel (%p214_p2) target bundleno = 698 (0x2ba), region = 44  ;;  %v1171_v3 = vpack.c.bf16 (!%p214_p2), %v272_v1, %v271_v0  ;;  %v274_v4 = vld [vmem:[%s1562_s1 + $0x18] sm:$0xff] (!%p214_p2)  ;;  %p244_p3 = scmp.lt.s32.totalorder (!%p214_p2), %s918_s29, 31  ;;  %v490_v5 = vld [vmem:[%s1563_s2] sm:$0xff] (!%p214_p2)  ;;  %v491_v6 = vld [vmem:[%s1563_s2 + $0x8] sm:$0xff] (!%p214_p2) }
   0x7   : > { %v1175_v7 = vpack.c.bf16 (!%p214_p2), %v274_v4, %v273_v2  ;;  %v1179_v8 = vpack.c.bf16 (!%p214_p2), %v491_v6, %v490_v5  ;;  %v492_v9 = vld [vmem:[%s1563_s2 + $0x10] sm:$0xff] (!%p214_p2)  ;;  %v493_v10 = vld [vmem:[%s1563_s2 + $0x18] sm:$0xff] (!%p214_p2)  ;;  %v494_v12 = vld [vmem:[%s1563_s2 + $0x20] sm:$0xff] (!%p214_p2) }
   0x8   : > { %1172 = vmatprep.subr.bf16.mxu0 (!%p214_p2), %v1171_v3  ;;  %v1183_v11 = vpack.c.bf16 (!%p214_p2), %v493_v10, %v492_v9  ;;  %v495_v13 = vld [vmem:[%s1563_s2 + $0x28] sm:$0xff] (!%p214_p2)  ;;  %v496_v16 = vld [vmem:[%s1563_s2 + $0x30] sm:$0xff] (!%p214_p2)  ;;  %v497_v17 = vld [vmem:[%s1563_s2 + $0x38] sm:$0xff] (!%p214_p2) }
   0x9   : > { %1174 = vmatpush3.bf16.msra.mxu0 (!%p214_p2), %v1171_v3  ;;  %1180 = vmatprep.subr.bf16.mxu1 (!%p214_p2), %v1179_v8  ;;  %v1187_v14 = vpack.c.bf16 (!%p214_p2), %v495_v13, %v494_v12  ;;  %v1191_v20 = vpack.c.bf16 (!%p214_p2), %v497_v17, %v496_v16  ;;  %v498_v21 = vld [vmem:[%s1563_s2 + $0x40] sm:$0xff] (!%p214_p2)  ;;  %v499_v22 = vld [vmem:[%s1563_s2 + $0x48] sm:$0xff] (!%p214_p2)  ;;  %v500_v26 = vld [vmem:[%s1563_s2 + $0x50] sm:$0xff] (!%p214_p2) }
   0xa   : > { %1176 = vmatprep.subr.bf16.mxu0 (!%p214_p2), %v1175_v7  ;;  %1182 = vmatpush3.bf16.msra.mxu1 (!%p214_p2), %v1179_v8  ;;  %v1195_v25 = vpack.c.bf16 (!%p214_p2), %v499_v22, %v498_v21  ;;  %v501_v27 = vld [vmem:[%s1563_s2 + $0x58] sm:$0xff] (!%p214_p2)  ;;  %v502_v31 = vld [vmem:[%s1563_s2 + $0x60] sm:$0xff] (!%p214_p2)  ;;  %v503_v32 = vld [vmem:[%s1563_s2 + $0x68] sm:$0xff] (!%p214_p2) }
   0xb   : > { %1184 = vmatprep.subr.bf16.mxu1 (!%p214_p2), %v1183_v11  ;;  %v1199_v30 = vpack.c.bf16 (!%p214_p2), %v501_v27, %v500_v26  ;;  %v1203_v35 = vpack.c.bf16 (!%p214_p2), %v503_v32, %v502_v31  ;;  %v504_v43 = vld [vmem:[%s1563_s2 + $0x70] sm:$0xff] (!%p214_p2)  ;;  %v505_v44 = vld [vmem:[%s1563_s2 + $0x78] sm:$0xff] (!%p214_p2)  ;;  %v672_v46 = vld [vmem:[%s1564_s3] sm:$0xff] (!%p214_p2) }
   0xc   : > { %v1207_v45 = vpack.c.bf16 (!%p214_p2), %v505_v44, %v504_v43  ;;  %v673_v47 = vld [vmem:[%s1564_s3 + $0x8] sm:$0xff] (!%p214_p2)  ;;  %v674_v48 = vld [vmem:[%s1564_s3 + $0x10] sm:$0xff] (!%p214_p2)  ;;  %v675_v50 = vld [vmem:[%s1564_s3 + $0x18] sm:$0xff] (!%p214_p2) }
   0xd   : > { %s1569_s29 = smov (!%p244_p3, %s918_s29), 31  ;;  %1178 = vmatpush3.bf16.msra.mxu0 %v1175_v7  ;;  %v1211_v49 = vpack.c.bf16 %v673_v47, %v672_v46  ;;  %v1215_v51 = vpack.c.bf16 %v675_v50, %v674_v48  ;;  %v676_v52 = vld [vmem:[%s1564_s3 + $0x20] sm:$0xff]  ;;  %v677_v53 = vld [vmem:[%s1564_s3 + $0x28] sm:$0xff]  ;;  %v678_v55 = vld [vmem:[%s1564_s3 + $0x30] sm:$0xff] }
   0xe   : > { %s919_s20 = sshll.u32 %s1569_s29, 3  ;;  %1186 = vmatpush3.bf16.msra.mxu1 %v1183_v11  ;;  %v1219_v54 = vpack.c.bf16 %v677_v53, %v676_v52  ;;  %v679_v56 = vld [vmem:[%s1564_s3 + $0x38] sm:$0xff]  ;;  %v680_v58 = vld [vmem:[%s1564_s3 + $0x40] sm:$0xff]  ;;  %v681_v59 = vld [vmem:[%s1564_s3 + $0x48] sm:$0xff] }
   0xf   : > { %s1356_s24 = scalar_lea.vmem %s1561_s0, %s919_s20  ;;  %1188 = vmatprep.subr.bf16.mxu1 %v1187_v14  ;;  %1212 = vmatprep.subr.bf16.mxu0 %v1211_v49  ;;  %v1444_v57 = vpack.c.bf16 %v679_v56, %v678_v55  ;;  %v1453_v60 = vpack.c.bf16 %v681_v59, %v680_v58  ;;  %v682_v61 = vld [vmem:[%s1564_s3 + $0x50] sm:$0xff]  ;;  %v683_v62 = vld [vmem:[%s1564_s3 + $0x58] sm:$0xff]  ;;  %v684_v0 = vld [vmem:[%s1564_s3 + $0x60] sm:$0xff]  ;;  %s1524_s22 = scalar_lea.vmem %s1567_s6, %s919_s20 }
  0x10   : > { %v255_v15 = vld [vmem:[%s1356_s24] sm:$0xff]  ;;  %v256_v18 = vld [vmem:[%s1356_s24 + $0x8] sm:$0xff]  ;;  %v257_v19 = vld [vmem:[%s1356_s24 + $0x10] sm:$0xff]  ;;  %v1463_v63 = vpack.c.bf16 %v683_v62, %v682_v61 }
  0x11   : > { %1035 = vmatprep.mubr.msk.f32.mxu0 %vm280_vm0, %v255_v15  ;;  %v258_v23 = vld [vmem:[%s1356_s24 + $0x18] sm:$0xff]  ;;  %v259_v24 = vld [vmem:[%s1356_s24 + $0x20] sm:$0xff]  ;;  %v260_v28 = vld [vmem:[%s1356_s24 + $0x28] sm:$0xff] }
  0x12   : > { %1036 = vmatmul.mubr.msk.f32.vlgmr.msra.gmra.mrb[0].mxu0 %vm280_vm0, %v256_v18  ;;  %1190 = vmatpush3.bf16.msra.mxu1 %v1187_v14  ;;  %v261_v29 = vld [vmem:[%s1356_s24 + $0x30] sm:$0xff]  ;;  %v262_v33 = vld [vmem:[%s1356_s24 + $0x38] sm:$0xff]  ;;  %v263_v34 = vld [vmem:[%s1356_s24 + $0x40] sm:$0xff] }
  0x13   : > { %1038 = vmatprep.mubr.msk.f32.mxu0 %vm280_vm0, %v257_v19  ;;  %1192 = vmatprep.subr.bf16.mxu1 %v1191_v20  ;;  %v264_v36 = vld [vmem:[%s1356_s24 + $0x48] sm:$0xff]  ;;  %v265_v37 = vld [vmem:[%s1356_s24 + $0x50] sm:$0xff]  ;;  %v266_v38 = vld [vmem:[%s1356_s24 + $0x58] sm:$0xff] }
  0x14   : > { %v267_v39 = vld [vmem:[%s1356_s24 + $0x60] sm:$0xff]  ;;  %v268_v40 = vld [vmem:[%s1356_s24 + $0x68] sm:$0xff]  ;;  %v269_v41 = vld [vmem:[%s1356_s24 + $0x70] sm:$0xff]  ;;  %1214 = vmatpush3.bf16.msra.mxu0 %v1211_v49 }
  0x15   : > { %v270_v42 = vld [vmem:[%s1356_s24 + $0x78] sm:$0xff]  ;;  %1216 = vmatprep.subr.bf16.mxu0 %v1215_v51  ;;  %v685_v1 = vld [vmem:[%s1564_s3 + $0x68] sm:$0xff]  ;;  %v1481_v3 = vld [vmem:[%s1565_s4] ss:$0 sm:$0xff] }
  0x16   : > { %1039 = vmatmul.mubr.msk.f32.gmra.mrb[2].mxu0 %vm280_vm0, %v258_v23  ;;  %1194 = vmatpush3.bf16.msra.mxu1 %v1191_v20  ;;  %v1473_v2 = vpack.c.bf16 %v685_v1, %v684_v0  ;;  %v686_v52 = vld [vmem:[%s1564_s3 + $0x70] sm:$0xff]  ;;  %v687_v53 = vld [vmem:[%s1564_s3 + $0x78] sm:$0xff]  ;;  %v939_v55 = vld [vmem:[%s1565_s4 + $0x1] ss:$0 sm:$0xff] }
  0x17   : > { %1041 = vmatprep.mubr.msk.f32.mxu0 %vm280_vm0, %v259_v24  ;;  %1196 = vmatprep.subr.bf16.mxu1 %v1195_v25 }
  0x18   : > { %1218 = vmatpush3.bf16.msra.mxu0 %v1215_v51 }
  0x19   : > { %1220 = vmatprep.subr.bf16.mxu0 %v1219_v54 }
  0x1a   : > { %1042 = vmatmul.mubr.msk.f32.gmra.mrb[4].mxu0 %vm280_vm0, %v260_v28  ;;  %1198 = vmatpush3.bf16.msra.mxu1 %v1195_v25 }
  0x1b   : > { %1044 = vmatprep.mubr.msk.f32.mxu0 %vm280_vm0, %v261_v29  ;;  %1200 = vmatprep.subr.bf16.mxu1 %v1199_v30 }
  0x1c   : > { %1222 = vmatpush3.bf16.msra.mxu0 %v1219_v54 }
  0x1d   : > { %1224 = vmatprep.subr.bf16.mxu0 %v1444_v57 }
  0x1e   : > { %1045 = vmatmul.mubr.msk.f32.gmra.mrb[6].mxu0 %vm280_vm0, %v262_v33  ;;  %1202 = vmatpush3.bf16.msra.mxu1 %v1199_v30 }
  0x1f   : > { %1047 = vmatprep.mubr.msk.f32.mxu0 %vm280_vm0, %v263_v34  ;;  %1204 = vmatprep.subr.bf16.mxu1 %v1203_v35 }
  0x20   : > { %1226 = vmatpush3.bf16.msra.mxu0 %v1444_v57 }
  0x21   : > { %1228 = vmatprep.subr.bf16.mxu0 %v1453_v60 }
  0x22   : > { %1048 = vmatmul.mubr.msk.f32.gmra.mrb[8].mxu0 %vm280_vm0, %v264_v36  ;;  %1206 = vmatpush3.bf16.msra.mxu1 %v1203_v35 }
  0x23   : > { %1050 = vmatprep.mubr.msk.f32.mxu0 %vm280_vm0, %v265_v37  ;;  %1208 = vmatprep.subr.bf16.mxu1 %v1207_v45 }
  0x24   : > { %1230 = vmatpush3.bf16.msra.mxu0 %v1453_v60 }
  0x25   : > { %1232 = vmatprep.subr.bf16.mxu0 %v1463_v63 }
  0x26   : > { %1051 = vmatmul.mubr.msk.f32.gmra.mrb[10].mxu0 %vm280_vm0, %v266_v38  ;;  %1210 = vmatpush3.bf16.msra.mxu1 %v1207_v45 }
  0x27   : > { %1053 = vmatprep.mubr.msk.f32.mxu0 %vm280_vm0, %v267_v39  ;;  %1243 = vmatprep.subr.bf16.mxu1 %v1211_v49 }
  0x28   : > { %1234 = vmatpush3.bf16.msra.mxu0 %v1463_v63 }
  0x29   : > { %1236 = vmatprep.subr.bf16.mxu0 %v1473_v2 }
  0x2a   : > { %1054 = vmatmul.mubr.msk.f32.gmra.mrb[12].mxu0 %vm280_vm0, %v268_v40 }
  0x2b   : > { %1056 = vmatprep.mubr.msk.f32.mxu0 %vm280_vm0, %v269_v41 }
  0x2c   : > { %1238 = vmatpush3.bf16.msra.mxu0 %v1473_v2 }
  0x2e   : > { %1057 = vmatmul.mubr.msk.f32.gmra.mrb[14].mxu0 %vm280_vm0, %v270_v42 }
  0xe5   : > { %v1037_v4 = vpop.f32.mrb[0].mxu0 }
  0xe6   : > { %v401_v5 = vadd.f32 %v1037_v4, %v1481_v3  ;;  %v395_v6 = vpop.f32.mrb[1].mxu0 }
  0xe7   : > { %v396_v7 = vadd.f32 %v1481_v3, %v395_v6 }
  0xe8   : > { %v475_v10 = vmax.f32 %v401_v5, 0.0 }
  0xe9   : > { %v1040_v8 = vpop.f32.mrb[2].mxu0  ;;  %v474_v9 = vmax.f32 %v396_v7, 0.0 }
  0xea   : > { %v411_v11 = vadd.f32 %v1040_v8, %v1481_v3  ;;  %v405_v12 = vpop.f32.mrb[3].mxu0 }
  0xeb   : > { %v406_v13 = vadd.f32 %v1481_v3, %v405_v12  ;;  %1091 = vmatprep.mubr.f32.mxu1 %v474_v9 }
  0xec   : > { %1092 = vmatmul.mubr.f32.vlgmr.msra.gmra.mrb[0].mxu1 %v475_v10  ;;  %v477_v16 = vmax.f32 %v411_v11, 0.0 }
  0xed   : > { %v476_v14 = vmax.f32 %v406_v13, 0.0  ;;  %v1043_v15 = vpop.f32.mrb[4].mxu0  ;;  %1251 = vmatpush3.bf16.msra.mxu1 %v1211_v49 }
  0xee   : > { %v421_v17 = vadd.f32 %v1043_v15, %v1481_v3  ;;  %v415_v18 = vpop.f32.mrb[5].mxu0  ;;  %1244 = vmatprep.subr.bf16.mxu1 %v1215_v51 }
  0xef   : > { %v416_v19 = vadd.f32 %v1481_v3, %v415_v18  ;;  %1094 = vmatprep.mubr.f32.mxu1 %v476_v14 }
  0xf0   : > { %1095 = vmatmul.mubr.f32.gmra.mrb[2].mxu1 %v477_v16  ;;  %v479_v22 = vmax.f32 %v421_v17, 0.0 }
  0xf1   : > { %v478_v20 = vmax.f32 %v416_v19, 0.0  ;;  %v1046_v21 = vpop.f32.mrb[6].mxu0  ;;  %1252 = vmatpush3.bf16.msra.mxu1 %v1215_v51 }
  0xf2   : > { %v431_v23 = vadd.f32 %v1046_v21, %v1481_v3  ;;  %v425_v24 = vpop.f32.mrb[7].mxu0  ;;  %1245 = vmatprep.subr.bf16.mxu1 %v1219_v54 }
  0xf3   : > { %v426_v25 = vadd.f32 %v1481_v3, %v425_v24  ;;  %1097 = vmatprep.mubr.f32.mxu1 %v478_v20 }
  0xf4   : > { %1098 = vmatmul.mubr.f32.gmra.mrb[4].mxu1 %v479_v22  ;;  %v481_v28 = vmax.f32 %v431_v23, 0.0 }
  0xf5   : > { %v480_v26 = vmax.f32 %v426_v25, 0.0  ;;  %v1049_v27 = vpop.f32.mrb[8].mxu0  ;;  %1253 = vmatpush3.bf16.msra.mxu1 %v1219_v54  ;;  %v1239_v54 = vpack.c.bf16 %v687_v53, %v686_v52 }
  0xf6   : > { %v441_v29 = vadd.f32 %v1049_v27, %v1481_v3  ;;  %v435_v30 = vpop.f32.mrb[9].mxu0  ;;  %1246 = vmatprep.subr.bf16.mxu1 %v1444_v57 }
  0xf7   : > { %v436_v31 = vadd.f32 %v1481_v3, %v435_v30  ;;  %1100 = vmatprep.mubr.f32.mxu1 %v480_v26  ;;  %1240 = vmatprep.subr.bf16.mxu0 %v1239_v54 }
  0xf8   : > { %1101 = vmatmul.mubr.f32.gmra.mrb[6].mxu1 %v481_v28  ;;  %v483_v34 = vmax.f32 %v441_v29, 0.0  ;;  %1242 = vmatpush3.bf16.msra.mxu0 %v1239_v54 }
  0xf9   : > { %v482_v32 = vmax.f32 %v436_v31, 0.0  ;;  %v1052_v33 = vpop.f32.mrb[10].mxu0  ;;  %1254 = vmatpush3.bf16.msra.mxu1 %v1444_v57 }
  0xfa   : > { %v451_v35 = vadd.f32 %v1052_v33, %v1481_v3  ;;  %v445_v36 = vpop.f32.mrb[11].mxu0  ;;  %1247 = vmatprep.subr.bf16.mxu1 %v1453_v60 }
  0xfb   : > { %v446_v37 = vadd.f32 %v1481_v3, %v445_v36  ;;  %1103 = vmatprep.mubr.f32.mxu1 %v482_v32 }
  0xfc   : > { %1104 = vmatmul.mubr.f32.gmra.mrb[8].mxu1 %v483_v34  ;;  %v485_v40 = vmax.f32 %v451_v35, 0.0 }
  0xfd   : > { %v484_v38 = vmax.f32 %v446_v37, 0.0  ;;  %v1055_v39 = vpop.f32.mrb[12].mxu0  ;;  %1255 = vmatpush3.bf16.msra.mxu1 %v1453_v60 }
  0xfe   : > { %v461_v41 = vadd.f32 %v1055_v39, %v1481_v3  ;;  %v455_v42 = vpop.f32.mrb[13].mxu0  ;;  %1248 = vmatprep.subr.bf16.mxu1 %v1463_v63 }
  0xff   : > { %v456_v43 = vadd.f32 %v1481_v3, %v455_v42  ;;  %1106 = vmatprep.mubr.f32.mxu1 %v484_v38 }
 0x100   : > { %1107 = vmatmul.mubr.f32.gmra.mrb[10].mxu1 %v485_v40  ;;  %v487_v46 = vmax.f32 %v461_v41, 0.0  ;;  %v940_v40 = vld [vmem:[%s1566_s5] ss:$0 sm:$0xff] }
 0x101   : > { %v486_v44 = vmax.f32 %v456_v43, 0.0  ;;  %v1058_v45 = vpop.f32.mrb[14].mxu0  ;;  %1256 = vmatpush3.bf16.msra.mxu1 %v1463_v63 }
 0x102   : > { %v471_v47 = vadd.f32 %v1058_v45, %v1481_v3  ;;  %v465_v48 = vpop.f32.mrb[15].mxu0  ;;  %1249 = vmatprep.subr.bf16.mxu1 %v1473_v2 }
 0x103   : > { %v466_v49 = vadd.f32 %v1481_v3, %v465_v48  ;;  %1109 = vmatprep.mubr.f32.mxu1 %v486_v44 }
 0x104   : > { %1110 = vmatmul.mubr.f32.gmra.mrb[12].mxu1 %v487_v46  ;;  %v489_v51 = vmax.f32 %v471_v47, 0.0 }
 0x105   : > { %v488_v50 = vmax.f32 %v466_v49, 0.0  ;;  %1257 = vmatpush3.bf16.msra.mxu1 %v1473_v2 }
 0x106   : > { %1250 = vmatprep.subr.bf16.mxu1 %v1239_v54 }
 0x107   : > { %1112 = vmatprep.mubr.f32.mxu1 %v488_v50 }
 0x108   : > { %1113 = vmatmul.mubr.f32.gmra.mrb[14].mxu1 %v489_v51 }
 0x109   : > { %1258 = vmatpush3.bf16.msra.mxu1 %v1239_v54 }
 0x1bf   : > { %v1093_v56 = vpop.f32.mrb[0].mxu1 }
 0x1c0   : > { %v583_v57 = vadd.f32 %v1093_v56, %v939_v55  ;;  %v577_v58 = vpop.f32.mrb[1].mxu1 }
 0x1c1   : > { %v578_v59 = vadd.f32 %v939_v55, %v577_v58 }
 0x1c2   : > { %v657_v62 = vmax.f32 %v583_v57, 0.0 }
 0x1c3   : > { %v656_v60 = vmax.f32 %v578_v59, 0.0  ;;  %v1096_v61 = vpop.f32.mrb[2].mxu1 }
 0x1c4   : > { %v593_v63 = vadd.f32 %v1096_v61, %v939_v55  ;;  %v587_v0 = vpop.f32.mrb[3].mxu1 }
 0x1c5   : > { %v588_v1 = vadd.f32 %v939_v55, %v587_v0  ;;  %1147 = vmatprep.mubr.f32.mxu0 %v656_v60 }
 0x1c6   : > { %1148 = vmatmul.mubr.f32.vlgmr.msra.gmra.mrb[16].mxu0 %v657_v62  ;;  %v659_v4 = vmax.f32 %v593_v63, 0.0 }
 0x1c7   : > { %v658_v2 = vmax.f32 %v588_v1, 0.0  ;;  %v1099_v3 = vpop.f32.mrb[4].mxu1 }
 0x1c8   : > { %v603_v5 = vadd.f32 %v1099_v3, %v939_v55  ;;  %v597_v6 = vpop.f32.mrb[5].mxu1 }
 0x1c9   : > { %v598_v7 = vadd.f32 %v939_v55, %v597_v6  ;;  %1150 = vmatprep.mubr.f32.mxu0 %v658_v2 }
 0x1ca   : > { %1151 = vmatmul.mubr.f32.gmra.mrb[18].mxu0 %v659_v4  ;;  %v661_v10 = vmax.f32 %v603_v5, 0.0 }
 0x1cb   : > { %v660_v8 = vmax.f32 %v598_v7, 0.0  ;;  %v1102_v9 = vpop.f32.mrb[6].mxu1 }
 0x1cc   : > { %v613_v11 = vadd.f32 %v1102_v9, %v939_v55  ;;  %v607_v12 = vpop.f32.mrb[7].mxu1 }
 0x1cd   : > { %v608_v13 = vadd.f32 %v939_v55, %v607_v12  ;;  %1153 = vmatprep.mubr.f32.mxu0 %v660_v8 }
 0x1ce   : > { %1154 = vmatmul.mubr.f32.gmra.mrb[20].mxu0 %v661_v10  ;;  %v663_v16 = vmax.f32 %v613_v11, 0.0 }
 0x1cf   : > { %v662_v14 = vmax.f32 %v608_v13, 0.0  ;;  %v1105_v15 = vpop.f32.mrb[8].mxu1 }
 0x1d0   : > { %v623_v17 = vadd.f32 %v1105_v15, %v939_v55  ;;  %v617_v18 = vpop.f32.mrb[9].mxu1 }
 0x1d1   : > { %v618_v19 = vadd.f32 %v939_v55, %v617_v18  ;;  %1156 = vmatprep.mubr.f32.mxu0 %v662_v14 }
 0x1d2   : > { %1157 = vmatmul.mubr.f32.gmra.mrb[22].mxu0 %v663_v16  ;;  %v665_v22 = vmax.f32 %v623_v17, 0.0 }
 0x1d3   : > { %v664_v20 = vmax.f32 %v618_v19, 0.0  ;;  %v1108_v21 = vpop.f32.mrb[10].mxu1 }
 0x1d4   : > { %v633_v23 = vadd.f32 %v1108_v21, %v939_v55  ;;  %v627_v24 = vpop.f32.mrb[11].mxu1 }
 0x1d5   : > { %v628_v25 = vadd.f32 %v939_v55, %v627_v24  ;;  %1159 = vmatprep.mubr.f32.mxu0 %v664_v20 }
 0x1d6   : > { %1160 = vmatmul.mubr.f32.gmra.mrb[24].mxu0 %v665_v22  ;;  %v667_v28 = vmax.f32 %v633_v23, 0.0 }
 0x1d7   : > { %v666_v26 = vmax.f32 %v628_v25, 0.0  ;;  %v1111_v27 = vpop.f32.mrb[12].mxu1 }
 0x1d8   : > { %v643_v29 = vadd.f32 %v1111_v27, %v939_v55  ;;  %v637_v30 = vpop.f32.mrb[13].mxu1 }
 0x1d9   : > { %v638_v31 = vadd.f32 %v939_v55, %v637_v30  ;;  %1162 = vmatprep.mubr.f32.mxu0 %v666_v26 }
 0x1da   : > { %1163 = vmatmul.mubr.f32.gmra.mrb[26].mxu0 %v667_v28  ;;  %v669_v34 = vmax.f32 %v643_v29, 0.0 }
 0x1db   : > { %v668_v32 = vmax.f32 %v638_v31, 0.0  ;;  %v1114_v33 = vpop.f32.mrb[14].mxu1 }
 0x1dc   : > { %v653_v35 = vadd.f32 %v1114_v33, %v939_v55  ;;  %v647_v36 = vpop.f32.mrb[15].mxu1 }
 0x1dd   : > { %v648_v37 = vadd.f32 %v939_v55, %v647_v36  ;;  %1165 = vmatprep.mubr.f32.mxu0 %v668_v32 }
 0x1de   : > { %1166 = vmatmul.mubr.f32.gmra.mrb[28].mxu0 %v669_v34  ;;  %v671_v39 = vmax.f32 %v653_v35, 0.0 }
 0x1df   : > { %v670_v38 = vmax.f32 %v648_v37, 0.0 }
 0x1e1   : > { %1168 = vmatprep.mubr.f32.mxu1 %v670_v38 }
 0x1e2   : > { %1169 = vmatmul.mubr.f32.vlgmr.msra.gmra.mrb[16].mxu1 %v671_v39 }
 0x299   : > { %v1149_v41 = vpop.f32.mrb[16].mxu0 }
 0x29a   : > { %v767_v42 = vadd.f32 %v1149_v41, %v940_v40  ;;  %v761_v43 = vpop.f32.mrb[17].mxu0 }
 0x29b   : > { %v762_v44 = vadd.f32 %v940_v40, %v761_v43 }
 0x29c   : > { %842 = vst.msk [vmem:[%s1524_s22 + $0x8] sm:$0xff] %vm840_vm1, %v767_v42 }
 0x29d   : > { %841 = vst.msk [vmem:[%s1524_s22] sm:$0xff] %vm840_vm1, %v762_v44  ;;  %v1152_v45 = vpop.f32.mrb[18].mxu0 }
 0x29e   : > { %v777_v46 = vadd.f32 %v1152_v45, %v940_v40  ;;  %v771_v47 = vpop.f32.mrb[19].mxu0 }
 0x29f   : > { %v772_v48 = vadd.f32 %v940_v40, %v771_v47 }
 0x2a0   : > { %844 = vst.msk [vmem:[%s1524_s22 + $0x18] sm:$0xff] %vm840_vm1, %v777_v46 }
 0x2a1   : > { %843 = vst.msk [vmem:[%s1524_s22 + $0x10] sm:$0xff] %vm840_vm1, %v772_v48  ;;  %v1155_v49 = vpop.f32.mrb[20].mxu0 }
 0x2a2   : > { %v787_v50 = vadd.f32 %v1155_v49, %v940_v40  ;;  %v781_v51 = vpop.f32.mrb[21].mxu0 }
 0x2a3   : > { %v782_v52 = vadd.f32 %v940_v40, %v781_v51 }
 0x2a4   : > { %846 = vst.msk [vmem:[%s1524_s22 + $0x28] sm:$0xff] %vm840_vm1, %v787_v50 }
 0x2a5   : > { %845 = vst.msk [vmem:[%s1524_s22 + $0x20] sm:$0xff] %vm840_vm1, %v782_v52  ;;  %v1158_v53 = vpop.f32.mrb[22].mxu0 }
 0x2a6   : > { %v797_v54 = vadd.f32 %v1158_v53, %v940_v40  ;;  %v791_v55 = vpop.f32.mrb[23].mxu0 }
 0x2a7   : > { %v792_v56 = vadd.f32 %v940_v40, %v791_v55 }
 0x2a8   : > { %848 = vst.msk [vmem:[%s1524_s22 + $0x38] sm:$0xff] %vm840_vm1, %v797_v54 }
 0x2a9   : > { %847 = vst.msk [vmem:[%s1524_s22 + $0x30] sm:$0xff] %vm840_vm1, %v792_v56  ;;  %v1161_v57 = vpop.f32.mrb[24].mxu0 }
 0x2aa   : > { %v807_v58 = vadd.f32 %v1161_v57, %v940_v40  ;;  %v801_v59 = vpop.f32.mrb[25].mxu0 }
 0x2ab   : > { %v802_v60 = vadd.f32 %v940_v40, %v801_v59 }
 0x2ac   : > { %850 = vst.msk [vmem:[%s1524_s22 + $0x48] sm:$0xff] %vm840_vm1, %v807_v58 }
 0x2ad   : > { %849 = vst.msk [vmem:[%s1524_s22 + $0x40] sm:$0xff] %vm840_vm1, %v802_v60  ;;  %v1164_v61 = vpop.f32.mrb[26].mxu0 }
 0x2ae   : > { %v817_v62 = vadd.f32 %v1164_v61, %v940_v40  ;;  %v811_v63 = vpop.f32.mrb[27].mxu0 }
 0x2af   : > { %v812_v0 = vadd.f32 %v940_v40, %v811_v63 }
 0x2b0   : > { %852 = vst.msk [vmem:[%s1524_s22 + $0x58] sm:$0xff] %vm840_vm1, %v817_v62 }
 0x2b1   : > { %851 = vst.msk [vmem:[%s1524_s22 + $0x50] sm:$0xff] %vm840_vm1, %v812_v0  ;;  %v1167_v1 = vpop.f32.mrb[28].mxu0 }
 0x2b2   : > { %v827_v2 = vadd.f32 %v1167_v1, %v940_v40  ;;  %v821_v3 = vpop.f32.mrb[29].mxu0 }
 0x2b3   : > { %v822_v4 = vadd.f32 %v940_v40, %v821_v3 }
 0x2b4   : > { %854 = vst.msk [vmem:[%s1524_s22 + $0x68] sm:$0xff] %vm840_vm1, %v827_v2 }
 0x2b5   : > { %853 = vst.msk [vmem:[%s1524_s22 + $0x60] sm:$0xff] %vm840_vm1, %v822_v4  ;;  %v1170_v5 = vpop.f32.mrb[16].mxu1 }
 0x2b6   : > { %v837_v6 = vadd.f32 %v1170_v5, %v940_v40  ;;  %v831_v7 = vpop.f32.mrb[17].mxu1 }
 0x2b7   : > { %v832_v8 = vadd.f32 %v940_v40, %v831_v7 }
 0x2b8   : > { %856 = vst.msk [vmem:[%s1524_s22 + $0x78] sm:$0xff] %vm840_vm1, %v837_v6 }
 0x2b9   : > { %855 = vst.msk [vmem:[%s1524_s22 + $0x70] sm:$0xff] %vm840_vm1, %v832_v8 }
 0x2ba PF: > { %s16_s21 = sadd.s32 1, %s1273_s21  }
 0x2bb   : > { %p13_p4 = scmp.ge.s32.totalorder %s16_s21, 4  }
 0x2bd   :  { %15 = sbr.rel (!%p13_p4) target bundleno = 1 (0x1), region = 74 }

</bundles_post_ra>
